<compile_context>
chip_gen: v7x
topology: tpu7x:2x2x1
jax: 0.10.0
libtpu: 0.0.40
codegen_flags: <defaults>
</compile_context>

<pallas_src>
import functools

import jax
import jax.numpy as jnp
from jax import lax
from jax.experimental import pallas as pl
from jax.experimental.pallas import tpu as pltpu

# ---------------- model hyper-parameters (ConvirtModel.__init__) -------------
ENCODING_D = 128        # encoding_size_d (small for the demo; default was 512)
TAU = 0.1
LOSS_WEIGHT = 0.75
RESNET_FEAT = 2048      # resnet.fc.in_features
BERT_FEAT = 768         # cbert.classifier.in_features
TRUNK_FEAT = 64         # pooled conv1 channels (trunk stub input width)
VOCAB = 128
EPS = 1e-8              # F.cosine_similarity eps
NEG_BIG = -1e30         # finite "-inf" for masked logits (avoids inf-inf NaNs)


# ------------------- Pallas kernel: fused heads + contrastive loss -----------
def _fused_kernel(fi_ref, wtv_ref, btv_ref, wv2_ref, bv2_ref,
                  ft_ref, wu12_ref, bu12_ref, wu2_ref, bu2_ref,
                  o_ref, *, tau, loss_weight, b_true):
    # -------- image tower: (trunk . fc . gv1 folded) -> relu -> gv2 ----------
    # single [BP,64] @ [64,D] bf16 matmul, f32 accumulation.
    h = jnp.dot(fi_ref[...], wtv_ref[...],
                preferred_element_type=jnp.float32) + btv_ref[...]
    h = jnp.maximum(h, 0.0)                                      # F.relu (f32)
    v = jnp.dot(h.astype(jnp.bfloat16), wv2_ref[...],
                preferred_element_type=jnp.float32) + bv2_ref[...]   # [BP,D]

    # -------- text tower: (classifier . gu1 folded) -> relu -> gu2 -----------
    h = jnp.dot(ft_ref[...], wu12_ref[...],
                preferred_element_type=jnp.float32) + bu12_ref[...]
    h = jnp.maximum(h, 0.0)
    u = jnp.dot(h.astype(jnp.bfloat16), wu2_ref[...],
                preferred_element_type=jnp.float32) + bu2_ref[...]   # [BP,D]

    # -------- cosine normalization: one clamped rsqrt per tower (EUP) --------
    # rsqrt(max(||x||^2, eps^2)) == 1/max(||x||, eps)  (exact cosine_similarity
    # clamp semantics); 1/tau is applied as an exact f32 multiply below.
    inv_nv = lax.rsqrt(jnp.maximum(jnp.sum(v * v, axis=-1, keepdims=True),
                                   EPS * EPS))                    # [BP,1]
    inv_nu = lax.rsqrt(jnp.maximum(jnp.sum(u * u, axis=-1, keepdims=True),
                                   EPS * EPS))                    # [BP,1]
    vh = v * inv_nv                                               # unit rows f32
    uh = u * inv_nu
    inv_tau = 1.0 / tau

    # diagonal similarities: rowwise f32 multiply-reduce (exact numerator).
    diag = jnp.sum(vh * uh, axis=-1, keepdims=True) * inv_tau     # [BP,1]

    # all-pairs cosine/tau matrix: bf16 MXU operands, f32 accumulate,
    # exact 1/tau scaling in f32 afterwards.
    S = lax.dot_general(vh.astype(jnp.bfloat16), uh.astype(jnp.bfloat16),
                        (((1,), (1,)), ((), ())),
                        preferred_element_type=jnp.float32) * inv_tau   # [BP,BP]

    # -------- mask padded rows/cols (b_true is the real batch size) ----------
    BP = S.shape[0]
    row_ids = lax.broadcasted_iota(jnp.int32, (BP, 1), 0)
    col_ids = lax.broadcasted_iota(jnp.int32, (1, BP), 1)
    rmask = (row_ids < b_true).astype(jnp.float32)                # [BP,1]
    cmask = (col_ids < b_true).astype(jnp.float32)                # [1,BP]
    S = jnp.where((row_ids < b_true) & (col_ids < b_true), S, NEG_BIG)

    # logsumexp over u (rows) and over v (columns of S) -- no S.T needed.
    mx_r = jnp.max(S, axis=-1, keepdims=True)
    lse_vu = jnp.log(jnp.sum(jnp.exp(S - mx_r), axis=-1, keepdims=True)) + mx_r  # [BP,1]
    mx_c = jnp.max(S, axis=0, keepdims=True)
    lse_uv = jnp.log(jnp.sum(jnp.exp(S - mx_c), axis=0, keepdims=True)) + mx_c   # [1,BP]

    # mean_i [ w*(-diag_i + lse_vu_i) + (1-w)*(-diag_i + lse_uv_i) ], real rows only
    sd = jnp.sum(diag * rmask, axis=0, keepdims=True)             # (1,1)
    s1 = jnp.sum(lse_vu * rmask, axis=0, keepdims=True)           # (1,1)
    s2 = jnp.sum(lse_uv * cmask, axis=1, keepdims=True)           # (1,1)
    total = (-sd + loss_weight * s1 + (1.0 - loss_weight) * s2) * (1.0 / b_true)
    o_ref[0, 0] = total[0, 0]                                     # scalar -> SMEM


def convirt_fused(feat_img, feat_txt, fused, *, tau=TAU, loss_weight=LOSS_WEIGHT):
    B = feat_img.shape[0]
    D = ENCODING_D
    # pad batch to a multiple of 16 (bf16 sublane pack); padded rows are masked
    # inside the kernel and the mean divides by the true B.
    BP = max(16, ((B + 15) // 16) * 16)
    fi = jnp.pad(feat_img.astype(jnp.bfloat16), ((0, BP - B), (0, 0)))
    ft = jnp.pad(feat_txt.astype(jnp.bfloat16), ((0, BP - B), (0, 0)))

    args = (fi, fused["wtv"], fused["btv"], fused["wv2"], fused["bv2"],
            ft, fused["wu12"], fused["bu12"], fused["wu2"], fused["bu2"])

    flops = 2 * BP * (TRUNK_FEAT * D + D * D + BERT_FEAT * D + D * D + BP * D)
    bytes_accessed = sum(int(a.size) * a.dtype.itemsize for a in args) + 4
    cost = pl.CostEstimate(flops=flops,
                           transcendentals=2 * BP * BP + 6 * BP,
                           bytes_accessed=bytes_accessed)

    vmem = pl.BlockSpec(memory_space=pltpu.MemorySpace.VMEM)
    out = pl.pallas_call(
        functools.partial(_fused_kernel, tau=tau, loss_weight=loss_weight,
                          b_true=B),
        out_shape=jax.ShapeDtypeStruct((1, 1), jnp.float32),
        in_specs=[vmem] * len(args),
        out_specs=pl.BlockSpec(memory_space=pltpu.MemorySpace.SMEM),
        cost_estimate=cost,
    )(*args)
    return out[0, 0]


# ----------------------- parameter init (deterministic) ----------------------
def _linear_init(key, fan_in, fan_out):
    k1, k2 = jax.random.split(key)
    lim = 1.0 / jnp.sqrt(jnp.float32(fan_in))
    w = jax.random.uniform(k1, (fan_in, fan_out), jnp.float32, -lim, lim)
    b = jax.random.uniform(k2, (fan_out,), jnp.float32, -lim, lim)
    return w, b


def init_params(key):
    ks = jax.random.split(key, 10)
    p = {}
    # resnet.conv1 replacement: Conv2d(1, 64, 7x7, stride 2, pad 3, bias=False)
    p["conv1_w"] = jax.random.normal(ks[0], (64, 1, 7, 7), jnp.float32) * 0.05
    # synthetic trunk: pooled conv features (64) -> resnet.fc.in_features (2048)
    p["trunk_w"] = jax.random.normal(ks[1], (TRUNK_FEAT, RESNET_FEAT), jnp.float32) * 0.02
    # resnet.fc : 2048 -> D
    p["fc_w"], p["fc_b"] = _linear_init(ks[2], RESNET_FEAT, ENCODING_D)
    p["gv1_w"], p["gv1_b"] = _linear_init(ks[3], ENCODING_D, ENCODING_D)
    p["gv2_w"], p["gv2_b"] = _linear_init(ks[4], ENCODING_D, ENCODING_D)
    # synthetic text embedding (ClinicalBERT stand-in), 768-wide
    p["embed"] = jax.random.normal(ks[5], (VOCAB, BERT_FEAT), jnp.float32) * 0.02
    # cbert.classifier : 768 -> D
    p["cls_w"], p["cls_b"] = _linear_init(ks[6], BERT_FEAT, ENCODING_D)
    p["gu1_w"], p["gu1_b"] = _linear_init(ks[7], ENCODING_D, ENCODING_D)
    p["gu2_w"], p["gu2_b"] = _linear_init(ks[8], ENCODING_D, ENCODING_D)
    return p


def fold_params(p):
    """One-time (init / param-update time) algebraic weight composition.

    There is no nonlinearity between trunk -> fc -> gv1, nor between
    classifier -> gu1, so they compose into single linears.  Runs OUTSIDE the
    jitted per-step forward so the folds are not paid on every call.
    """
    f32, bf16 = jnp.float32, jnp.bfloat16
    wtv = (p["trunk_w"] @ p["fc_w"] @ p["gv1_w"]).astype(bf16)           # [64,D]
    btv = (p["fc_b"] @ p["gv1_w"] + p["gv1_b"]).reshape(1, -1).astype(f32)
    wu12 = (p["cls_w"] @ p["gu1_w"]).astype(bf16)                        # [768,D]
    bu12 = (p["cls_b"] @ p["gu1_w"] + p["gu1_b"]).reshape(1, -1).astype(f32)
    return {
        "conv1_w": p["conv1_w"],
        "embed": p["embed"],
        "wtv": wtv, "btv": btv,
        "wv2": p["gv2_w"].astype(bf16), "bv2": p["gv2_b"].reshape(1, -1).astype(f32),
        "wu12": wu12, "bu12": bu12,
        "wu2": p["gu2_w"].astype(bf16), "bu2": p["gu2_b"].reshape(1, -1).astype(f32),
    }


# ----------------------------- forward (glue + kernel) -----------------------
@jax.jit
def convirt_forward(fused, img, input_ids):
    # ---- image trunk (JAX glue) --------------------------------------------
    # conv1: NCHW input, OIHW weights, stride 2, pad 3 (exactly the replaced
    # nn.Conv2d(1, 64, 7, 2, 3, bias=False)).
    x = lax.conv_general_dilated(
        img, fused["conv1_w"], window_strides=(2, 2),
        padding=((3, 3), (3, 3)),
        dimension_numbers=("NCHW", "OIHW", "NCHW"))
    x = jnp.maximum(x, 0.0)
    feat_img = jnp.mean(x, axis=(2, 3))                    # [B, 64] global pool

    # ---- text trunk (JAX glue) ---------------------------------------------
    emb = fused["embed"][input_ids]                        # [B, T, 768]
    feat_txt = jnp.mean(emb, axis=1)                       # [B, 768] pooled stub

    # ---- both projection heads + bidirectional contrastive loss (Pallas) ----
    return convirt_fused(feat_img, feat_txt, fused)


# ---------------------------------- main --------------------------------------
if __name__ == "__main__":
    key = jax.random.PRNGKey(0)
    k_par, k_img, k_txt = jax.random.split(key, 3)

    B, H, W, T = 8, 32, 32, 8
    params = init_params(k_par)
    fused = fold_params(params)          # hoisted: runs once, not per step
    img = jax.random.normal(k_img, (B, 1, H, W), jnp.float32)        # NCHW
    input_ids = jax.random.randint(k_txt, (B, T), 0, VOCAB, jnp.int32)

    loss = convirt_forward(fused, img, input_ids)
    loss = jax.block_until_ready(loss)
    assert loss.shape == () and bool(jnp.isfinite(loss))
    print("KERNEL_OK")
</pallas_src>

<mosaic_0001>
module attributes {stable_mosaic.version = 11 : i64} {
  func.func @_fused_kernel(%arg0: memref<16x64xbf16, #tpu.memory_space<vmem>>, %arg1: memref<64x128xbf16, #tpu.memory_space<vmem>>, %arg2: memref<1x128xf32, #tpu.memory_space<vmem>>, %arg3: memref<128x128xbf16, #tpu.memory_space<vmem>>, %arg4: memref<1x128xf32, #tpu.memory_space<vmem>>, %arg5: memref<16x768xbf16, #tpu.memory_space<vmem>>, %arg6: memref<768x128xbf16, #tpu.memory_space<vmem>>, %arg7: memref<1x128xf32, #tpu.memory_space<vmem>>, %arg8: memref<128x128xbf16, #tpu.memory_space<vmem>>, %arg9: memref<1x128xf32, #tpu.memory_space<vmem>>, %arg10: memref<1x1xf32, #tpu.memory_space<smem>>) attributes {dimension_semantics = [], scalar_prefetch = 0 : i64, scratch_operands = 0 : i64, tpu.core_type = #tpu.core_type<tc>} {
    %c0 = arith.constant 0 : index
    %c0_0 = arith.constant 0 : index
    %0 = vector.load %arg0[%c0, %c0_0] : memref<16x64xbf16, #tpu.memory_space<vmem>>, vector<16x64xbf16>
    %c0_1 = arith.constant 0 : index
    %c0_2 = arith.constant 0 : index
    %1 = vector.load %arg1[%c0_1, %c0_2] : memref<64x128xbf16, #tpu.memory_space<vmem>>, vector<64x128xbf16>
    %cst = arith.constant dense<0.000000e+00> : vector<16x128xf32>
    %2 = tpu.matmul %0, %1, %cst {dimension_numbers = #tpu.dot_dimension_numbers<[1], [0], [0], [1], [0, 0, 1, 1], [], []>} : vector<16x64xbf16>, vector<64x128xbf16>, vector<16x128xf32> -> vector<16x128xf32>
    %c0_3 = arith.constant 0 : index
    %c0_4 = arith.constant 0 : index
    %3 = vector.load %arg2[%c0_3, %c0_4] : memref<1x128xf32, #tpu.memory_space<vmem>>, vector<1x128xf32>
    %4 = vector.broadcast %3 : vector<1x128xf32> to vector<16x128xf32>
    %5 = arith.addf %2, %4 : vector<16x128xf32>
    %cst_5 = arith.constant 0.000000e+00 : f32
    %6 = vector.broadcast %cst_5 : f32 to vector<16x128xf32>
    %7 = arith.maximumf %5, %6 : vector<16x128xf32>
    %8 = arith.truncf %7 : vector<16x128xf32> to vector<16x128xbf16>
    %c0_6 = arith.constant 0 : index
    %c0_7 = arith.constant 0 : index
    %9 = vector.load %arg3[%c0_6, %c0_7] : memref<128x128xbf16, #tpu.memory_space<vmem>>, vector<128x128xbf16>
    %cst_8 = arith.constant dense<0.000000e+00> : vector<16x128xf32>
    %10 = tpu.matmul %8, %9, %cst_8 {dimension_numbers = #tpu.dot_dimension_numbers<[1], [0], [0], [1], [0, 0, 1, 1], [], []>} : vector<16x128xbf16>, vector<128x128xbf16>, vector<16x128xf32> -> vector<16x128xf32>
    %c0_9 = arith.constant 0 : index
    %c0_10 = arith.constant 0 : index
    %11 = vector.load %arg4[%c0_9, %c0_10] : memref<1x128xf32, #tpu.memory_space<vmem>>, vector<1x128xf32>
    %12 = vector.broadcast %11 : vector<1x128xf32> to vector<16x128xf32>
    %13 = arith.addf %10, %12 : vector<16x128xf32>
    %c0_11 = arith.constant 0 : index
    %c0_12 = arith.constant 0 : index
    %14 = vector.load %arg5[%c0_11, %c0_12] : memref<16x768xbf16, #tpu.memory_space<vmem>>, vector<16x768xbf16>
    %c0_13 = arith.constant 0 : index
    %c0_14 = arith.constant 0 : index
    %15 = vector.load %arg6[%c0_13, %c0_14] : memref<768x128xbf16, #tpu.memory_space<vmem>>, vector<768x128xbf16>
    %cst_15 = arith.constant dense<0.000000e+00> : vector<16x128xf32>
    %16 = tpu.matmul %14, %15, %cst_15 {dimension_numbers = #tpu.dot_dimension_numbers<[1], [0], [0], [1], [0, 0, 1, 1], [], []>} : vector<16x768xbf16>, vector<768x128xbf16>, vector<16x128xf32> -> vector<16x128xf32>
    %c0_16 = arith.constant 0 : index
    %c0_17 = arith.constant 0 : index
    %17 = vector.load %arg7[%c0_16, %c0_17] : memref<1x128xf32, #tpu.memory_space<vmem>>, vector<1x128xf32>
    %18 = vector.broadcast %17 : vector<1x128xf32> to vector<16x128xf32>
    %19 = arith.addf %16, %18 : vector<16x128xf32>
    %cst_18 = arith.constant 0.000000e+00 : f32
    %20 = vector.broadcast %cst_18 : f32 to vector<16x128xf32>
    %21 = arith.maximumf %19, %20 : vector<16x128xf32>
    %22 = arith.truncf %21 : vector<16x128xf32> to vector<16x128xbf16>
    %c0_19 = arith.constant 0 : index
    %c0_20 = arith.constant 0 : index
    %23 = vector.load %arg8[%c0_19, %c0_20] : memref<128x128xbf16, #tpu.memory_space<vmem>>, vector<128x128xbf16>
    %cst_21 = arith.constant dense<0.000000e+00> : vector<16x128xf32>
    %24 = tpu.matmul %22, %23, %cst_21 {dimension_numbers = #tpu.dot_dimension_numbers<[1], [0], [0], [1], [0, 0, 1, 1], [], []>} : vector<16x128xbf16>, vector<128x128xbf16>, vector<16x128xf32> -> vector<16x128xf32>
    %c0_22 = arith.constant 0 : index
    %c0_23 = arith.constant 0 : index
    %25 = vector.load %arg9[%c0_22, %c0_23] : memref<1x128xf32, #tpu.memory_space<vmem>>, vector<1x128xf32>
    %26 = vector.broadcast %25 : vector<1x128xf32> to vector<16x128xf32>
    %27 = arith.addf %24, %26 : vector<16x128xf32>
    %28 = arith.mulf %13, %13 : vector<16x128xf32>
    %cst_24 = arith.constant dense<0.000000e+00> : vector<16xf32>
    %29 = vector.multi_reduction <add>, %28, %cst_24 [1] : vector<16x128xf32> to vector<16xf32>
    %30 = vector.shape_cast %29 : vector<16xf32> to vector<16x1xf32>
    %cst_25 = arith.constant 1.000000e-16 : f32
    %31 = vector.broadcast %cst_25 : f32 to vector<16x1xf32>
    %32 = arith.maximumf %30, %31 : vector<16x1xf32>
    %33 = math.rsqrt %32 : vector<16x1xf32>
    %34 = arith.mulf %27, %27 : vector<16x128xf32>
    %cst_26 = arith.constant dense<0.000000e+00> : vector<16xf32>
    %35 = vector.multi_reduction <add>, %34, %cst_26 [1] : vector<16x128xf32> to vector<16xf32>
    %36 = vector.shape_cast %35 : vector<16xf32> to vector<16x1xf32>
    %cst_27 = arith.constant 1.000000e-16 : f32
    %37 = vector.broadcast %cst_27 : f32 to vector<16x1xf32>
    %38 = arith.maximumf %36, %37 : vector<16x1xf32>
    %39 = math.rsqrt %38 : vector<16x1xf32>
    %40 = vector.broadcast %33 : vector<16x1xf32> to vector<16x128xf32>
    %41 = arith.mulf %13, %40 : vector<16x128xf32>
    %42 = vector.broadcast %39 : vector<16x1xf32> to vector<16x128xf32>
    %43 = arith.mulf %27, %42 : vector<16x128xf32>
    %44 = arith.mulf %41, %43 : vector<16x128xf32>
    %cst_28 = arith.constant dense<0.000000e+00> : vector<16xf32>
    %45 = vector.multi_reduction <add>, %44, %cst_28 [1] : vector<16x128xf32> to vector<16xf32>
    %46 = vector.shape_cast %45 : vector<16xf32> to vector<16x1xf32>
    %cst_29 = arith.constant 1.000000e+01 : f32
    %47 = vector.broadcast %cst_29 : f32 to vector<16x1xf32>
    %48 = arith.mulf %46, %47 : vector<16x1xf32>
    %49 = arith.truncf %41 : vector<16x128xf32> to vector<16x128xbf16>
    %50 = arith.truncf %43 : vector<16x128xf32> to vector<16x128xbf16>
    %cst_30 = arith.constant dense<0.000000e+00> : vector<16x16xf32>
    %51 = tpu.matmul %49, %50, %cst_30 {dimension_numbers = #tpu.dot_dimension_numbers<[1], [1], [0], [0], [0, 0, 1, 0], [], []>} : vector<16x128xbf16>, vector<16x128xbf16>, vector<16x16xf32> -> vector<16x16xf32>
    %cst_31 = arith.constant 1.000000e+01 : f32
    %52 = vector.broadcast %cst_31 : f32 to vector<16x16xf32>
    %53 = arith.mulf %51, %52 : vector<16x16xf32>
    %54 = tpu.iota {dimensions = array<i32: 0>} : vector<16x1xi32>
    %55 = tpu.iota {dimensions = array<i32: 1>} : vector<1x16xi32>
    %c8_i32 = arith.constant 8 : i32
    %56 = vector.broadcast %c8_i32 : i32 to vector<16x1xi32>
    %57 = arith.cmpi slt, %54, %56 : vector<16x1xi32>
    %58 = arith.extui %57 : vector<16x1xi1> to vector<16x1xi32>
    %59 = arith.sitofp %58 : vector<16x1xi32> to vector<16x1xf32>
    %c8_i32_32 = arith.constant 8 : i32
    %60 = vector.broadcast %c8_i32_32 : i32 to vector<1x16xi32>
    %61 = arith.cmpi slt, %55, %60 : vector<1x16xi32>
    %62 = arith.extui %61 : vector<1x16xi1> to vector<1x16xi32>
    %63 = arith.sitofp %62 : vector<1x16xi32> to vector<1x16xf32>
    %c8_i32_33 = arith.constant 8 : i32
    %64 = vector.broadcast %c8_i32_33 : i32 to vector<16x1xi32>
    %65 = arith.cmpi slt, %54, %64 : vector<16x1xi32>
    %c8_i32_34 = arith.constant 8 : i32
    %66 = vector.broadcast %c8_i32_34 : i32 to vector<1x16xi32>
    %67 = arith.cmpi slt, %55, %66 : vector<1x16xi32>
    %68 = vector.broadcast %65 : vector<16x1xi1> to vector<16x16xi1>
    %69 = vector.broadcast %67 : vector<1x16xi1> to vector<16x16xi1>
    %70 = arith.andi %68, %69 : vector<16x16xi1>
    %cst_35 = arith.constant -1.000000e+30 : f32
    %71 = vector.broadcast %cst_35 : f32 to vector<16x16xf32>
    %72 = arith.select %70, %53, %71 : vector<16x16xi1>, vector<16x16xf32>
    %cst_36 = arith.constant dense<0xFF800000> : vector<16xf32>
    %73 = vector.multi_reduction <maximumf>, %72, %cst_36 [1] : vector<16x16xf32> to vector<16xf32>
    %74 = vector.shape_cast %73 : vector<16xf32> to vector<16x1xf32>
    %75 = vector.broadcast %74 : vector<16x1xf32> to vector<16x16xf32>
    %76 = arith.subf %72, %75 : vector<16x16xf32>
    %77 = math.exp %76 : vector<16x16xf32>
    %cst_37 = arith.constant dense<0.000000e+00> : vector<16xf32>
    %78 = vector.multi_reduction <add>, %77, %cst_37 [1] : vector<16x16xf32> to vector<16xf32>
    %79 = vector.shape_cast %78 : vector<16xf32> to vector<16x1xf32>
    %80 = math.log %79 : vector<16x1xf32>
    %81 = arith.addf %80, %74 : vector<16x1xf32>
    %cst_38 = arith.constant dense<0xFF800000> : vector<16xf32>
    %82 = vector.multi_reduction <maximumf>, %72, %cst_38 [0] : vector<16x16xf32> to vector<16xf32>
    %83 = vector.shape_cast %82 : vector<16xf32> to vector<1x16xf32>
    %84 = vector.broadcast %83 : vector<1x16xf32> to vector<16x16xf32>
    %85 = arith.subf %72, %84 : vector<16x16xf32>
    %86 = math.exp %85 : vector<16x16xf32>
    %cst_39 = arith.constant dense<0.000000e+00> : vector<16xf32>
    %87 = vector.multi_reduction <add>, %86, %cst_39 [0] : vector<16x16xf32> to vector<16xf32>
    %88 = vector.shape_cast %87 : vector<16xf32> to vector<1x16xf32>
    %89 = math.log %88 : vector<1x16xf32>
    %90 = arith.addf %89, %83 : vector<1x16xf32>
    %91 = arith.mulf %48, %59 : vector<16x1xf32>
    %cst_40 = arith.constant dense<0.000000e+00> : vector<1xf32>
    %92 = vector.multi_reduction <add>, %91, %cst_40 [0] : vector<16x1xf32> to vector<1xf32>
    %93 = vector.shape_cast %92 : vector<1xf32> to vector<1x1xf32>
    %94 = arith.mulf %81, %59 : vector<16x1xf32>
    %cst_41 = arith.constant dense<0.000000e+00> : vector<1xf32>
    %95 = vector.multi_reduction <add>, %94, %cst_41 [0] : vector<16x1xf32> to vector<1xf32>
    %96 = vector.shape_cast %95 : vector<1xf32> to vector<1x1xf32>
    %97 = arith.mulf %90, %63 : vector<1x16xf32>
    %cst_42 = arith.constant dense<0.000000e+00> : vector<1xf32>
    %98 = vector.multi_reduction <add>, %97, %cst_42 [1] : vector<1x16xf32> to vector<1xf32>
    %99 = vector.shape_cast %98 : vector<1xf32> to vector<1x1xf32>
    %cst_43 = arith.constant 0.000000e+00 : f32
    %100 = vector.broadcast %cst_43 : f32 to vector<1x1xf32>
    %101 = arith.subf %100, %93 : vector<1x1xf32>
    %cst_44 = arith.constant 7.500000e-01 : f32
    %102 = vector.broadcast %cst_44 : f32 to vector<1x1xf32>
    %103 = arith.mulf %102, %96 : vector<1x1xf32>
    %104 = arith.addf %101, %103 : vector<1x1xf32>
    %cst_45 = arith.constant 2.500000e-01 : f32
    %105 = vector.broadcast %cst_45 : f32 to vector<1x1xf32>
    %106 = arith.mulf %105, %99 : vector<1x1xf32>
    %107 = arith.addf %104, %106 : vector<1x1xf32>
    %cst_46 = arith.constant 1.250000e-01 : f32
    %108 = vector.broadcast %cst_46 : f32 to vector<1x1xf32>
    %109 = arith.mulf %107, %108 : vector<1x1xf32>
    %110 = vector.extract %109[0, 0] : f32 from vector<1x1xf32>
    %c0_47 = arith.constant 0 : index
    %c0_48 = arith.constant 0 : index
    %111 = memref.load %arg10[%c0_47, %c0_48] : memref<1x1xf32, #tpu.memory_space<smem>>
    memref.store %110, %arg10[%c0_47, %c0_48] : memref<1x1xf32, #tpu.memory_space<smem>>
    return
  }
}

</mosaic_0001>

<bundles_post_ra>
// kernel: convirt_forward.1
= control target key start
LH: loop header
LB: loop body
LE: loop exit
PB: predicated region body
PF: predicated region fallthrough
CT: control target
= control target key end

     0   :  { %v1448_v1 = vmov 0.0   ;;  %vm1449_vm0 = vmmov 0   ;;  %vm83_vm1 = vcmask 523264   ;;  %s1813_s0 = inlined_call_operand.vmem [shape: bf16[16,64], index: 0, kind: input, shape index: {}]   ;;  %s1814_s1 = inlined_call_operand.vmem [shape: bf16[64,128], index: 1, kind: input, shape index: {}]   ;;  %s1815_s2 = inlined_call_operand.vmem [shape: f32[1,128], index: 2, kind: input, shape index: {}]   ;;  %s1816_s3 = inlined_call_operand.vmem [shape: bf16[128,128], index: 3, kind: input, shape index: {}]   ;;  %s1817_s4 = inlined_call_operand.vmem [shape: f32[1,128], index: 4, kind: input, shape index: {}]   ;;  %s1818_s5 = inlined_call_operand.vmem [shape: bf16[16,768], index: 5, kind: input, shape index: {}]   ;;  %s1819_s6 = inlined_call_operand.vmem [shape: bf16[768,128], index: 6, kind: input, shape index: {}]   ;;  %s1820_s7 = inlined_call_operand.vmem [shape: f32[1,128], index: 7, kind: input, shape index: {}]   ;;  %s1821_s8 = inlined_call_operand.vmem [shape: bf16[128,128], index: 8, kind: input, shape index: {}]   ;;  %s1822_s9 = inlined_call_operand.vmem [shape: f32[1,128], index: 9, kind: input, shape index: {}]   ;;  %s1823_s10 = inlined_call_operand.hbm [shape: f32[1,1], index: 10, kind: output, shape index: {}]  }
   0x1   :  { %v1336_v0 = vld [vmem:[%s1814_s1] sm:$0xff]   ;;  %1272 = vmatprep.subr.bf16.mxu0 %v1448_v1  ;;  %1284 = vmatprep.subr.bf16.mxu1 %v1448_v1  ;;  %v1337_v2 = vld [vmem:[%s1814_s1 + $0x8] sm:$0xff]   ;;  %v1338_v3 = vld [vmem:[%s1814_s1 + $0x10] sm:$0xff]  }
   0x2   :  { %1273 = vmatpush3.bf16.msra.mxu0 %v1336_v0  ;;  %1280 = vmatprep.mubr.msk.bf16.mxu0 %vm1449_vm0, %v1448_v1  ;;  %v1343_v4 = vld [vmem:[%s1816_s3] sm:$0xff]   ;;  %v1339_v5 = vld [vmem:[%s1814_s1 + $0x18] sm:$0xff]   ;;  %v1346_v6 = vld [vmem:[%s1816_s3 + $0x8] sm:$0xff]  }
   0x3   :  { %1274 = vmatprep.subr.bf16.mxu0 %v1448_v1  ;;  %1300 = vmatprep.mubr.msk.bf16.mxu1 %vm1449_vm0, %v1448_v1  ;;  %v1341_v7 = vld [vmem:[%s1819_s6 + $0x40] sm:$0xff]   ;;  %v1349_v9 = vld [vmem:[%s1816_s3 + $0x10] sm:$0xff]   ;;  %v1344_v11 = vld [vmem:[%s1819_s6 + $0x48] sm:$0xff]  }
   0x4   :  { %1285 = vmatpush3.bf16.msra.mxu1 %v1343_v4  ;;  %v1340_v8 = vld [vmem:[%s1813_s0] sm:$0xff]   ;;  %v1352_v12 = vld [vmem:[%s1816_s3 + $0x18] sm:$0xff]   ;;  %v1345_v13 = vld [vmem:[%s1819_s6 + $0x8] sm:$0xff]  }
   0x5   :  { %1286 = vmatprep.subr.bf16.mxu1 %v1448_v1  ;;  %v1342_v10 = vld [vmem:[%s1819_s6] sm:$0xff]   ;;  %v1347_v14 = vld [vmem:[%s1819_s6 + $0x50] sm:$0xff]   ;;  %v1350_v17 = vld [vmem:[%s1819_s6 + $0x58] sm:$0xff]  }
   0x6   :  { %1275 = vmatpush3.bf16.msra.mxu0 %v1337_v2  ;;  %v1355_v15 = vld [vmem:[%s1816_s3 + $0x20] sm:$0xff]   ;;  %v1348_v16 = vld [vmem:[%s1819_s6 + $0x10] sm:$0xff]   ;;  %v1351_v18 = vld [vmem:[%s1819_s6 + $0x18] sm:$0xff]  }
   0x7   :  { %1276 = vmatprep.subr.bf16.mxu0 %v1448_v1  ;;  %v1358_v19 = vld [vmem:[%s1816_s3 + $0x28] sm:$0xff]   ;;  %v1353_v20 = vld [vmem:[%s1819_s6 + $0x60] sm:$0xff]   ;;  %v1359_v24 = vld [vmem:[%s1819_s6 + $0x70] sm:$0xff]  }
   0x8   :  { %1287 = vmatpush3.bf16.msra.mxu1 %v1346_v6  ;;  %v1354_v21 = vld [vmem:[%s1819_s6 + $0x20] sm:$0xff]   ;;  %v1356_v22 = vld [vmem:[%s1819_s6 + $0x68] sm:$0xff]  }
   0x9   :  { %1288 = vmatprep.subr.bf16.mxu1 %v1448_v1  ;;  %v1357_v23 = vld [vmem:[%s1819_s6 + $0x28] sm:$0xff]  }
   0xa   :  { %1277 = vmatpush3.bf16.msra.mxu0 %v1338_v3 }
   0xb   :  { %1278 = vmatprep.subr.bf16.mxu0 %v1448_v1 }
   0xc   :  { %1289 = vmatpush3.bf16.msra.mxu1 %v1349_v9 }
   0xd   :  { %1290 = vmatprep.subr.bf16.mxu1 %v1448_v1 }
   0xe   :  { %1279 = vmatpush3.bf16.msra.mxu0 %v1339_v5 }
   0xf   :  { %1195 = vmatprep.subr.bf16.mxu0 %v1341_v7 }
  0x10   :  { %1291 = vmatpush3.bf16.msra.mxu1 %v1352_v12 }
  0x11   :  { %1281 = vmatmul.mubr.msk.bf16.vlgmr.msra.gmra.mrb[0].mxu0 %vm83_vm1, %v1340_v8  ;;  %1292 = vmatprep.subr.bf16.mxu1 %v1448_v1 }
  0x12   :  { %1196 = vmatpush3.bf16.msra.mxu0 %v1342_v10 }
  0x13   :  { %1197 = vmatprep.subr.bf16.mxu0 %v1344_v11 }
  0x14   :  { %1293 = vmatpush3.bf16.msra.mxu1 %v1355_v15 }
  0x15   :  { %1294 = vmatprep.subr.bf16.mxu1 %v1448_v1 }
  0x16   :  { %1198 = vmatpush3.bf16.msra.mxu0 %v1345_v13 }
  0x17   :  { %1199 = vmatprep.subr.bf16.mxu0 %v1347_v14 }
  0x18   :  { %1295 = vmatpush3.bf16.msra.mxu1 %v1358_v19 }
  0x19   :  { %1296 = vmatprep.subr.bf16.mxu1 %v1448_v1 }
  0x1a   :  { %1200 = vmatpush3.bf16.msra.mxu0 %v1348_v16 }
  0x1b   :  { %1201 = vmatprep.subr.bf16.mxu0 %v1350_v17 }
  0x1e   :  { %1202 = vmatpush3.bf16.msra.mxu0 %v1351_v18 }
  0x1f   :  { %1203 = vmatprep.subr.bf16.mxu0 %v1353_v20 }
  0x22   :  { %1204 = vmatpush3.bf16.msra.mxu0 %v1354_v21 }
  0x23   :  { %1205 = vmatprep.subr.bf16.mxu0 %v1356_v22 }
  0x26   :  { %1206 = vmatpush3.bf16.msra.mxu0 %v1357_v23 }
  0x27   :  { %1207 = vmatprep.subr.bf16.mxu0 %v1359_v24 }
  0x28   :  { %15 = vsyncpa [#allocation3], 0  ;;  %v1360_v25 = vld [vmem:[%s1819_s6 + $0x30] sm:$0xff]   ;;  %v1362_v27 = vld [vmem:[%s1819_s6 + $0x78] sm:$0xff]   ;;  %vm1006_vm2 = vcmask 130048   ;;  %s1436_s29 = scalar_lea.hbm %s1823_s10, 16 }
  0x29   :  { %v1361_v26 = vld [vmem:[%s1816_s3 + $0x30] sm:$0xff]   ;;  %v1363_v28 = vld [vmem:[%s1819_s6 + $0x38] sm:$0xff]   ;;  %v1368_v31 = vld [vmem:[%s1819_s6 + $0x140] sm:$0xff]   ;;  %p1437_p0 = scmp.ne.s32.totalorder %s1823_s10, %s1436_s29  ;;  %p1440_p1 = scmp.lt.u32.totalorder %s1436_s29, %s1823_s10 }
  0x2a   :  { %1208 = vmatpush3.bf16.msra.mxu0 %v1360_v25  ;;  %1297 = vmatpush3.bf16.msra.mxu1 %v1361_v26  ;;  %v1364_v29 = vld [vmem:[%s1816_s3 + $0x38] sm:$0xff]   ;;  %v1369_v33 = vld [vmem:[%s1819_s6 + $0xc0] sm:$0xff]   ;;  %v1372_v35 = vld [vmem:[%s1819_s6 + $0x148] sm:$0xff]  }
  0x2b   :  { %1298 = vmatprep.subr.bf16.mxu1 %v1448_v1  ;;  %1209 = vmatprep.subr.bf16.mxu0 %v1362_v27  ;;  %v1367_v30 = vld [vmem:[%s1818_s5 + $0x4] ss:$24 sps:$4 sm:$0xff]   ;;  %v1365_v32 = vld [vmem:[%s1818_s5] ss:$24 sps:$4 sm:$0xff]   ;;  %v1374_v36 = vld [vmem:[%s1819_s6 + $0x108] sm:$0xff]   ;;  %p1442_p2 = pnand %p1440_p1, %p1437_p0 }
  0x2c   :  { %v1370_v34 = vld [vmem:[%s1819_s6 + $0x100] sm:$0xff]   ;;  %702 = vmatprep.mubr.bf16.mxu0 %v1367_v30  ;;  %v1376_v37 = vld [vmem:[%s1819_s6 + $0x150] sm:$0xff]   ;;  %v1380_v39 = vld [vmem:[%s1819_s6 + $0x158] sm:$0xff]  }
  0x2d   :  { %v1378_v38 = vld [vmem:[%s1819_s6 + $0x110] sm:$0xff]   ;;  %v1382_v40 = vld [vmem:[%s1819_s6 + $0x118] sm:$0xff]   ;;  %v1384_v41 = vld [vmem:[%s1819_s6 + $0x160] sm:$0xff]  }
  0x2e   :  { %1210 = vmatpush3.bf16.msra.mxu0 %v1363_v28  ;;  %1299 = vmatpush3.bf16.msra.mxu1 %v1364_v29  ;;  %v1386_v42 = vld [vmem:[%s1819_s6 + $0x120] sm:$0xff]   ;;  %v1388_v43 = vld [vmem:[%s1819_s6 + $0x168] sm:$0xff]   ;;  %v1392_v45 = vld [vmem:[%s1819_s6 + $0x170] sm:$0xff]  }
  0x2f   :  { %1239 = vmatprep.subr.bf16.mxu0 %v1368_v31  ;;  %1217 = vmatprep.subr.bf16.mxu1 %v1369_v33  ;;  %v1390_v44 = vld [vmem:[%s1819_s6 + $0x128] sm:$0xff]   ;;  %v1394_v46 = vld [vmem:[%s1819_s6 + $0x130] sm:$0xff]   ;;  %v1396_v47 = vld [vmem:[%s1819_s6 + $0x178] sm:$0xff]  }
  0x30   :  { %v1398_v48 = vld [vmem:[%s1819_s6 + $0x138] sm:$0xff]   ;;  %v1402_v49 = vld [vmem:[%s1818_s5 + $0x14] ss:$24 sps:$4 sm:$0xff]   ;;  %v1400_v50 = vld [vmem:[%s1818_s5 + $0x10] ss:$24 sps:$4 sm:$0xff]  }
  0x31   :  { %703 = vmatmul.mubr.bf16.vlgmr.msra.gmra.mrb[4].mxu0 %v1365_v32  ;;  %v1100_v51 = vld [vmem:[%s1815_s2] ss:$0 sm:$0xff]  ;;  %v1405_v61 = vld [vmem:[%s1818_s5 + $0xc] ss:$24 sps:$4 sm:$0xff]   ;;  %v1377_v2 = vld [vmem:[%s1819_s6 + $0xd0] sm:$0xff]  }
  0x32   :  { %1240 = vmatpush3.bf16.msra.mxu0 %v1370_v34  ;;  %784 = vmatprep.mubr.bf16.mxu0 %v1402_v49  ;;  %v1371_v60 = vld [vmem:[%s1819_s6 + $0x80] sm:$0xff]   ;;  %v1373_v63 = vld [vmem:[%s1819_s6 + $0xc8] sm:$0xff]   ;;  %v1379_v3 = vld [vmem:[%s1819_s6 + $0x90] sm:$0xff]  }
  0x33   :  { %1241 = vmatprep.subr.bf16.mxu0 %v1372_v35  ;;  %v1375_v0 = vld [vmem:[%s1819_s6 + $0x88] sm:$0xff]   ;;  %v1381_v4 = vld [vmem:[%s1819_s6 + $0xd8] sm:$0xff]   ;;  %v1385_v6 = vld [vmem:[%s1819_s6 + $0xe0] sm:$0xff]  }
  0x34   :  { %v1383_v5 = vld [vmem:[%s1819_s6 + $0x98] sm:$0xff]   ;;  %v1387_v7 = vld [vmem:[%s1819_s6 + $0xa0] sm:$0xff]   ;;  %v1389_v8 = vld [vmem:[%s1819_s6 + $0xe8] sm:$0xff]  }
  0x35   :  { %v1391_v9 = vld [vmem:[%s1819_s6 + $0xa8] sm:$0xff]   ;;  %v1393_v10 = vld [vmem:[%s1819_s6 + $0xf0] sm:$0xff]   ;;  %v1397_v12 = vld [vmem:[%s1819_s6 + $0xf8] sm:$0xff]  }
  0x36   :  { %1242 = vmatpush3.bf16.msra.mxu0 %v1374_v36  ;;  %v1395_v11 = vld [vmem:[%s1819_s6 + $0xb0] sm:$0xff]   ;;  %v1399_v13 = vld [vmem:[%s1819_s6 + $0xb8] sm:$0xff]   ;;  %v1403_v14 = vld [vmem:[%s1818_s5 + $0x8] ss:$24 sps:$4 sm:$0xff]  }
  0x37   :  { %1243 = vmatprep.subr.bf16.mxu0 %v1376_v37  ;;  %v1406_v21 = vld [vmem:[%s1821_s8] sm:$0xff]   ;;  %v1407_v22 = vld [vmem:[%s1821_s8 + $0x8] sm:$0xff]   ;;  %v1408_v23 = vld [vmem:[%s1821_s8 + $0x10] sm:$0xff]  }
  0x38   :  { %v1409_v24 = vld [vmem:[%s1821_s8 + $0x18] sm:$0xff]   ;;  %v1410_v25 = vld [vmem:[%s1821_s8 + $0x20] sm:$0xff]   ;;  %v1411_v30 = vld [vmem:[%s1821_s8 + $0x28] sm:$0xff]  }
  0x39   :  { %v1412_v33 = vld [vmem:[%s1821_s8 + $0x30] sm:$0xff]   ;;  %v1413_v34 = vld [vmem:[%s1821_s8 + $0x38] sm:$0xff]   ;;  %v1107_v35 = vld [vmem:[%s1817_s4] ss:$0 sm:$0xff] }
  0x3a   :  { %1244 = vmatpush3.bf16.msra.mxu0 %v1378_v38 }
  0x3b   :  { %1245 = vmatprep.subr.bf16.mxu0 %v1380_v39 }
  0x3e   :  { %1246 = vmatpush3.bf16.msra.mxu0 %v1382_v40 }
  0x3f   :  { %1247 = vmatprep.subr.bf16.mxu0 %v1384_v41 }
  0x42   :  { %1248 = vmatpush3.bf16.msra.mxu0 %v1386_v42 }
  0x43   :  { %1249 = vmatprep.subr.bf16.mxu0 %v1388_v43 }
  0x46   :  { %1250 = vmatpush3.bf16.msra.mxu0 %v1390_v44  ;;  %v1116_v44 = vld [vmem:[%s1820_s7] ss:$0 sm:$0xff] }
  0x47   :  { %1251 = vmatprep.subr.bf16.mxu0 %v1392_v45 }
  0x4a   :  { %1252 = vmatpush3.bf16.msra.mxu0 %v1394_v46 }
  0x4b   :  { %1253 = vmatprep.subr.bf16.mxu0 %v1396_v47 }
  0x4e   :  { %1254 = vmatpush3.bf16.msra.mxu0 %v1398_v48 }
  0x4f   :  { %1324 = vmatprep.subr.bf16.mxu0 %v1448_v1 }
  0x51   :  { %785 = vmatmul.mubr.bf16.vlgmr.msra.gmra.mrb[8].mxu0 %v1400_v50 }
  0x52   :  { %1326 = vmatprep.mubr.msk.bf16.mxu0 %vm1449_vm0, %v1448_v1 }
  0xe4   :  { %v121_v52 = vpop.f32.mrb[0].mxu0 }
  0xe5   :  { %v122_v53 = vadd.f32 %v1100_v51, %v121_v52  ;;  %v1282_v54 = vpop.f32.mrb[1].mxu0 }
  0xe6   :  { %v124_v55 = vpop.f32.mrb[2].mxu0 }
  0xe7   :  { %v125_v56 = vadd.f32 %v1100_v51, %v124_v55  ;;  %v1283_v57 = vpop.f32.mrb[3].mxu0  ;;  %v128_v58 = vmax.f32 %v122_v53, 0.0 }
  0xe9   :  { %v129_v59 = vmax.f32 %v125_v56, 0.0 }
  0xeb   :  { %v130_v62 = vpack.c.bf16 %v129_v59, %v128_v58 }
  0xed   :  { %1301 = vmatmul.mubr.bf16.vlgmr.msra.gmra.mrb[0].mxu1 %v130_v62 }
  0xee   :  { %1218 = vmatpush3.bf16.msra.mxu1 %v1371_v60  ;;  %743 = vmatprep.mubr.bf16.mxu1 %v1405_v61  ;;  %v1171_v60 = vld [vmem:[%s1822_s9] ss:$0 sm:$0xff] }
  0xef   :  { %1219 = vmatprep.subr.bf16.mxu1 %v1373_v63 }
  0xf2   :  { %1220 = vmatpush3.bf16.msra.mxu1 %v1375_v0 }
  0xf3   :  { %1221 = vmatprep.subr.bf16.mxu1 %v1377_v2 }
  0xf6   :  { %1222 = vmatpush3.bf16.msra.mxu1 %v1379_v3 }
  0xf7   :  { %1223 = vmatprep.subr.bf16.mxu1 %v1381_v4 }
  0xfa   :  { %1224 = vmatpush3.bf16.msra.mxu1 %v1383_v5 }
  0xfb   :  { %1225 = vmatprep.subr.bf16.mxu1 %v1385_v6  ;;  %v1450_v6 = vmov -inf  }
  0xfe   :  { %1226 = vmatpush3.bf16.msra.mxu1 %v1387_v7  ;;  %v1010_v7 = vsel %vm1006_vm2, -1e+30, %v1450_v6 }
  0xff   :  { %1227 = vmatprep.subr.bf16.mxu1 %v1389_v8 }
 0x102   :  { %1228 = vmatpush3.bf16.msra.mxu1 %v1391_v9 }
 0x103   :  { %1229 = vmatprep.subr.bf16.mxu1 %v1393_v10 }
 0x104   :  { %v1211_v15 = vpop.f32.mrb[4].mxu0 }
 0x105   :  { %v1212_v16 = vpop.f32.mrb[5].mxu0 }
 0x106   :  { %1230 = vmatpush3.bf16.msra.mxu1 %v1395_v11  ;;  %v1213_v17 = vadd.f32 %v1212_v16, %v1211_v15  ;;  %v1214_v18 = vpop.f32.mrb[6].mxu0 }
 0x107   :  { %1231 = vmatprep.subr.bf16.mxu1 %v1397_v12  ;;  %v1215_v19 = vpop.f32.mrb[7].mxu0 }
 0x108   :  { %v1216_v20 = vadd.f32 %v1215_v19, %v1214_v18  ;;  %v705_v47 = vadd.f32 %v1213_v17, %v1116_v44 }
 0x10a   :  { %1232 = vmatpush3.bf16.msra.mxu1 %v1399_v13  ;;  %v708_v51 = vadd.f32 %v1216_v20, %v1116_v44 }
 0x10b   :  { %1304 = vmatprep.subr.bf16.mxu1 %v1448_v1 }
 0x10d   :  { %744 = vmatmul.mubr.bf16.vlgmr.msra.gmra.mrb[4].mxu1 %v1403_v14 }
 0x10e   :  { %1320 = vmatprep.mubr.msk.bf16.mxu1 %vm1449_vm0, %v1448_v1  ;;  %1305 = vmatpush3.bf16.msra.mxu1 %v1406_v21 }
 0x10f   :  { %1306 = vmatprep.subr.bf16.mxu1 %v1448_v1 }
 0x112   :  { %1307 = vmatpush3.bf16.msra.mxu1 %v1407_v22 }
 0x113   :  { %1308 = vmatprep.subr.bf16.mxu1 %v1448_v1 }
 0x116   :  { %1309 = vmatpush3.bf16.msra.mxu1 %v1408_v23 }
 0x117   :  { %1310 = vmatprep.subr.bf16.mxu1 %v1448_v1 }
 0x11a   :  { %1311 = vmatpush3.bf16.msra.mxu1 %v1409_v24 }
 0x11b   :  { %1312 = vmatprep.subr.bf16.mxu1 %v1448_v1 }
 0x11e   :  { %1313 = vmatpush3.bf16.msra.mxu1 %v1410_v25 }
 0x11f   :  { %1314 = vmatprep.subr.bf16.mxu1 %v1448_v1 }
 0x122   :  { %1315 = vmatpush3.bf16.msra.mxu1 %v1411_v30 }
 0x123   :  { %1316 = vmatprep.subr.bf16.mxu1 %v1448_v1 }
 0x124   :  { %v1255_v26 = vpop.f32.mrb[8].mxu0 }
 0x125   :  { %v1256_v27 = vpop.f32.mrb[9].mxu0 }
 0x126   :  { %v1257_v28 = vadd.f32 %v1256_v27, %v1255_v26  ;;  %v1258_v29 = vpop.f32.mrb[10].mxu0  ;;  %1317 = vmatpush3.bf16.msra.mxu1 %v1412_v33 }
 0x127   :  { %v1259_v31 = vpop.f32.mrb[11].mxu0  ;;  %1318 = vmatprep.subr.bf16.mxu1 %v1448_v1 }
 0x128   :  { %v1260_v32 = vadd.f32 %v1259_v31, %v1258_v29 }
 0x12a   :  { %1319 = vmatpush3.bf16.msra.mxu1 %v1413_v34 }
 0x1c0   :  { %v236_v36 = vpop.f32.mrb[0].mxu1 }
 0x1c1   :  { %v1767_v37 = vadd.f32 %v1107_v35, %v236_v36  ;;  %v1302_v38 = vpop.f32.mrb[1].mxu1 }
 0x1c2   :  { %v239_v39 = vpop.f32.mrb[2].mxu1 }
 0x1c3   :  { %v1769_v40 = vadd.f32 %v1107_v35, %v239_v39  ;;  %v1303_v41 = vpop.f32.mrb[3].mxu1  ;;  %v908_v42 = vmul.f32 %v1767_v37, %v1767_v37 }
 0x1c5   :  { %910 = vadd.xlane.f32.xlu1 %v908_v42  ;;  %v909_v43 = vmul.f32 %v1769_v40, %v1769_v40 }
 0x1c9   :  { %912 = vadd.xlane.f32.xlu1 %v909_v43 }
 0x1e0   :  { %v1233_v45 = vpop.f32.mrb[4].mxu1 }
 0x1e1   :  { %v1234_v46 = vpop.f32.mrb[5].mxu1 }
 0x1e2   :  { %v1235_v48 = vadd.f32 %v1234_v46, %v1233_v45  ;;  %v1236_v49 = vpop.f32.mrb[6].mxu1 }
 0x1e3   :  { %v1237_v50 = vpop.f32.mrb[7].mxu1 }
 0x1e4   :  { %v746_v52 = vadd.f32 %v1235_v48, %v705_v47  ;;  %v1238_v53 = vadd.f32 %v1237_v50, %v1236_v49 }
 0x1e6   :  { %v787_v54 = vadd.f32 %v1257_v28, %v746_v52  ;;  %v749_v55 = vadd.f32 %v1238_v53, %v708_v51 }
 0x1e8   :  { %v790_v56 = vadd.f32 %v1260_v32, %v749_v55  ;;  %v793_v57 = vmax.f32 %v787_v54, 0.0  ;;  %v988_v32 = vlaneseq }
 0x1ea   :  { %v794_v58 = vmax.f32 %v790_v56, 0.0  ;;  %v989_v33 = vand.u32 127, %v988_v32 }
 0x1ec   :  { %v795_v59 = vpack.c.bf16 %v794_v58, %v793_v57  ;;  %vm996_vm3 = vcmp.lt.s32.totalorder %v989_v33, 8 }
 0x1ee   :  { %1321 = vmatmul.mubr.bf16.vlgmr.msra.gmra.mrb[8].mxu1 %v795_v59 }
 0x252   :  { %v911_v8 = vpop.xlane.xlu1 %910 }
 0x253   :  { %v914_v15 = vmax.f32 %v911_v8, 1e-16 }
 0x256   :  { %v913_v11 = vpop.xlane.xlu1 %912 }
 0x257   :  { %v915_v14 = vmax.f32 %v913_v11, 1e-16 }
 0x2c1   :  { %v901_v61 = vpop.f32.mrb[8].mxu1 }
 0x2c2   :  { %v902_v62 = vadd.f32 %v1171_v60, %v901_v61  ;;  %v1322_v63 = vpop.f32.mrb[9].mxu1 }
 0x2c3   :  { %v904_v0 = vpop.f32.mrb[10].mxu1 }
 0x2c4   :  { %v905_v2 = vadd.f32 %v1171_v60, %v904_v0  ;;  %v1323_v3 = vpop.f32.mrb[11].mxu1  ;;  %v918_v4 = vmul.f32 %v902_v62, %v902_v62 }
 0x2c6   :  { %920 = vadd.xlane.f32.xlu0 %v918_v4  ;;  %v919_v5 = vmul.f32 %v905_v2, %v905_v2 }
 0x2ca   :  { %922 = vadd.xlane.f32.xlu0 %v919_v5 }
 0x2ce   :  { %1011 = vmax.xlane.f32.xlu0 %v1010_v7 }
 0x353   :  { %v921_v9 = vpop.xlane.xlu0 %920 }
 0x354   :  { %v924_v10 = vmax.f32 %v921_v9, 1e-16 }
 0x356   :  { %1414 = vrsqrt.f32 %v924_v10 }
 0x357   :  { %v923_v12 = vpop.xlane.xlu0 %922 }
 0x358   :  { %v925_v13 = vmax.f32 %v923_v12, 1e-16 }
 0x35a   :  { %1416 = vrsqrt.f32 %v925_v13 }
 0x35b   :  { %v1782_v16 = vpop.xlane.xlu0 %1011  ;;  %1418 = vrsqrt.f32 %v915_v14 }
 0x35c   :  { %v1014_v17 = vsub.f32 -1e+30, %v1782_v16  ;;  %1420 = vrsqrt.f32 %v914_v15 }
 0x35e   :  { %v1017_v18 = vmul.f32 1.442695, %v1014_v17 }
 0x360   :  { %1422 = vpow2.f32 %v1017_v18  ;;  %v1415_v19 = vpop.eup %1414 }
 0x361   :  { %v1785_v21 = vmul.f32 %v1415_v19, %v902_v62 }
 0x364   :  { %v1417_v20 = vpop.eup %1416 }
 0x365   :  { %v931_v22 = vmul.f32 %v1417_v20, %v905_v2  ;;  %v1419_v23 = vpop.eup %1418  ;;  %v1180_v2 = vsel %vm996_vm3, 1.0, %v1448_v1 }
 0x366   :  { %v1421_v25 = vpop.eup %1420  ;;  %v929_v27 = vmul.f32 %v1419_v23, %v1769_v40 }
 0x367   :  { %v941_v24 = vpack.c.bf16 %v931_v22, %v1785_v21  ;;  %v928_v29 = vmul.f32 %v1421_v25, %v1767_v37 }
 0x368   :  { %v933_v31 = vmul.f32 %v931_v22, %v929_v27 }
 0x369   :  { %1325 = vmatpush3.bf16.xpose.msra.mxu0 %v941_v24  ;;  %v940_v30 = vpack.c.bf16 %v929_v27, %v928_v29  ;;  %v932_v11 = vmul.f32 %v1785_v21, %v928_v29 }
 0x36a   :  { %v1423_v26 = vpop.eup %1422 }
 0x36b   :  { %v1022_v28 = vsel %vm1006_vm2, %v1423_v26, 0.0 }
 0x36c   :  { %1023 = vadd.xlane.f32.xlu0 %v1022_v28 }
 0x370   :  { %1327 = vmatmul.mubr.bf16.vlgmr.msra.gmra.mrb[12].mxu0 %v940_v30  ;;  %936 = vadd.xlane.f32.xlu0 %v933_v31 }
 0x3f9   :  { %v1024_v12 = vpop.xlane.xlu0 %1023 }
 0x3fd   :  { %v937_v13 = vpop.xlane.xlu0 %936 }
 0x3fe   :  { %v939_v14 = vmul.f32 10.0, %v937_v13 }
 0x400   :  { %v1057_v18 = vmul.f32 0.0, %v939_v14 }
 0x443   :  { %v976_v34 = vpop.f32.mrb[12].mxu0 }
 0x444   :  { %v983_v35 = vmul.f32 10.0, %v976_v34  ;;  %v1328_v36 = vpop.f32.mrb[13].mxu0 }
 0x445   :  { %v979_v38 = vpop.f32.mrb[14].mxu0 }
 0x446   :  { %v1004_v39 = vsel %vm996_vm3, %v983_v35, -1e+30  ;;  %v1329_v41 = vpop.f32.mrb[15].mxu0 }
 0x447   :  { %v1007_v40 = vsel %vm1006_vm2, %v1004_v39, -inf }
 0x448   :  { %1008 = vmax.xlane.f32.xlu1 %v1007_v40  ;;  %v1031_v42 = vmax.f32 %v1007_v40, %v1010_v7 }
 0x44a   :  { %v1032_v43 = vrot.slane %v1031_v42, 4 }
 0x44c   :  { %v1033_v37 = vmax.f32 %v1031_v42, %v1032_v43 }
 0x44e   :  { %v1034_v44 = vrot.slane %v1033_v37, 2 }
 0x450   :  { %v1035_v45 = vmax.f32 %v1033_v37, %v1034_v44 }
 0x452   :  { %v1036_v46 = vrot.slane %v1035_v45, 1 }
 0x454   :  { %v1037_v47 = vmax.f32 %v1035_v45, %v1036_v46 }
 0x456   :  { %v1038_v48 = vsub.f32 %v1004_v39, %v1037_v47  ;;  %v1039_v49 = vsub.f32 -1e+30, %v1037_v47 }
 0x458   :  { %v1040_v50 = vmul.f32 1.442695, %v1038_v48  ;;  %v1042_v51 = vmul.f32 1.442695, %v1039_v49 }
 0x45a   :  { %1424 = vpow2.f32 %v1040_v50 }
 0x45b   :  { %1426 = vpow2.f32 %v1042_v51 }
 0x464   :  { %v1425_v52 = vpop.eup %1424 }
 0x465   :  { %v1427_v53 = vpop.eup %1426  ;;  %v1044_v54 = vsel %vm1006_vm2, %v1425_v52, 0.0 }
 0x466   :  { %v1045_v55 = vsel %vm1006_vm2, %v1427_v53, 0.0 }
 0x467   :  { %v1046_v56 = vadd.f32 %v1045_v55, %v1044_v54 }
 0x469   :  { %v1047_v57 = vrot.slane %v1046_v56, 4 }
 0x46b   :  { %v1048_v58 = vadd.f32 %v1047_v57, %v1046_v56 }
 0x46d   :  { %v1049_v59 = vrot.slane %v1048_v58, 2 }
 0x46f   :  { %v1050_v60 = vadd.f32 %v1049_v59, %v1048_v58 }
 0x471   :  { %v1051_v61 = vrot.slane %v1050_v60, 1 }
 0x473   :  { %v1052_v62 = vadd.f32 %v1051_v61, %v1050_v60 }
 0x475   :  { %1428 = vlog2.f32 %v1052_v62 }
 0x47f   :  { %v1429_v63 = vpop.eup %1428 }
 0x480   :  { %v1054_v0 = vmul.f32 0.6931472, %v1429_v63 }
 0x482   :  { %v1055_v3 = vadd.f32 %v1054_v0, %v1037_v47 }
 0x484   :  { %v1074_v4 = vmul.f32 %v1180_v2, %v1055_v3 }
 0x486   :  { %v1075_v5 = vsel %vm1006_vm2, %v1074_v4, 0.0 }
 0x487   :  { %1076 = vadd.xlane.f32.xlu0 %v1075_v5 }
 0x4d5   :  { %v1009_v6 = vpop.xlane.xlu1 %1008 }
 0x4d6   :  { %v1013_v7 = vsub.f32 %v1004_v39, %v1009_v6 }
 0x4d8   :  { %v1015_v8 = vmul.f32 1.442695, %v1013_v7 }
 0x4da   :  { %1430 = vpow2.f32 %v1015_v8 }
 0x4db   :  { %1432 = vlog2.f32 %v1024_v12 }
 0x4e4   :  { %v1431_v9 = vpop.eup %1430 }
 0x4e5   :  { %v1019_v10 = vsel %vm1006_vm2, %v1431_v9, 0.0  ;;  %v1433_v15 = vpop.eup %1432 }
 0x4e6   :  { %1020 = vadd.xlane.f32.xlu1 %v1019_v10  ;;  %v1028_v20 = vmul.f32 0.6931472, %v1433_v15 }
 0x4e8   :  { %v1030_v24 = vadd.f32 %v1028_v20, %v1782_v16 }
 0x4ea   :  { %934 = vadd.xlane.f32.xlu1 %v932_v11  ;;  %v1066_v21 = vmul.f32 0.0, %v1030_v24 }
 0x514   :  { %v1077_v40 = vpop.xlane.xlu0 %1076 }
 0x515   :  { %v1081_v16 = vmul.f32 0.25, %v1077_v40 }
 0x573   :  { %v1021_v1 = vpop.xlane.xlu1 %1020 }
 0x574   :  { %1434 = vlog2.f32 %v1021_v1 }
 0x577   :  { %v935_v17 = vpop.xlane.xlu1 %934 }
 0x578   :  { %v938_v19 = vmul.f32 10.0, %v935_v17 }
 0x57a   :  { %v1058_v22 = vadd.f32 %v1057_v18, %v938_v19 }
 0x57c   :  { %v1059_v23 = vrot.slane %v1058_v22, 4 }
 0x57e   :  { %v1435_v25 = vpop.eup %1434  ;;  %v1060_v26 = vadd.f32 %v1059_v23, %v1058_v22 }
 0x57f   :  { %v1026_v27 = vmul.f32 0.6931472, %v1435_v25 }
 0x580   :  { %v1061_v29 = vrot.slane %v1060_v26, 2 }
 0x581   :  { %v1029_v28 = vadd.f32 %v1026_v27, %v1009_v6 }
 0x582   :  { %v1062_v32 = vadd.f32 %v1061_v29, %v1060_v26 }
 0x583   :  { %v1067_v30 = vadd.f32 %v1066_v21, %v1029_v28 }
 0x584   :  { %v1063_v34 = vrot.slane %v1062_v32, 1 }
 0x585   :  { %v1068_v31 = vrot.slane %v1067_v30, 4 }
 0x586   :  { %v1064_v38 = vadd.f32 %v1063_v34, %v1062_v32 }
 0x587   :  { %v1069_v33 = vadd.f32 %v1068_v31, %v1067_v30 }
 0x588   :  { %v1078_v42 = vsub.f32 0.0, %v1064_v38 }
 0x589   :  { %v1070_v35 = vrot.slane %v1069_v33, 2 }
 0x58b   :  { %v1071_v36 = vadd.f32 %v1070_v35, %v1069_v33 }
 0x58d   :  { %v1072_v39 = vrot.slane %v1071_v36, 1 }
 0x58f   :  { %v1073_v41 = vadd.f32 %v1072_v39, %v1071_v36 }
 0x591   :  { %v1079_v43 = vmul.f32 0.75, %v1073_v41 }
 0x593   :  { %v1080_v37 = vadd.f32 %v1079_v43, %v1078_v42 }
 0x595   :  { %v1082_v44 = vadd.f32 %v1081_v16, %v1080_v37 }
 0x597   :  { %v1083_v45 = vmul.f32 0.125, %v1082_v44 }
 0x599   :  { %1330 = vpush %v1083_v45 }
 0x5ca   :  { %s1331_s7 = spop %1330 }
 0x5cb   :  { %1086 = sst [smem:[#allocation2]] %s1331_s7 }
 0x5cc   :  { %1445 = shalt.err (!%p1442_p2)
}
 0x5cd   :  { %s1451_s13 = smov [#allocation2]  }
 0x5ce   :  { %1094 = dma.smem_to_hbm %s1451_s13, 16, %s1823_s10, [#allocation3]  }
 0x5cf   :  { %1446 = dma.done.wait [#allocation3], 16  }
 0x5d0   :  { %1447 = vsyncadd [#allocation3], 4294967280 }
 0x5d1   :  { %1098 = sfence }
 0x5d2   :  { %1099 = vsyncpa [#allocation3], 1 }

</bundles_post_ra>
